<compile_context>
chip_gen: v7x
topology: tpu7x:2x2x1
jax: 0.10.0
libtpu: 0.0.40
codegen_flags: <defaults>
</compile_context>

<pallas_src>
import functools

import jax
import jax.numpy as jnp
from jax.experimental import pallas as pl
from jax.experimental.pallas import tpu as pltpu


def _smear_kernel(sig_ref, k_ref, o_ref, *, shift, axis):
    # Compact path:    sig (hb*S, 1),   k/o (hb*S, D),  shift=1, axis=0 (sublane roll)
    # Lane-dense path: sig (hb, S*D),   k/o (hb, S*D),  shift=D, axis=1 (lane roll)
    k = k_ref[...]
    sig = sig_ref[...]
    # Positive shift: out[r] picks up k[r-1] (jnp.roll semantics).  The wrapped row
    # (token 0 of each head) is multiplied by (1 - sig) == 0, so it never shows.
    k_prev = pltpu.roll(k, shift=shift, axis=axis)
    o_ref[...] = (sig * k + (1 - sig) * k_prev).astype(o_ref.dtype)


def _pick_heads_per_block(n_heads, bytes_per_head, target_bytes, legal, batch,
                          min_steps=4, min_block_bytes=256 * 1024):
    """Largest layout-legal divisor of n_heads whose block fits `target_bytes`;
    then, if it costs nothing (blocks stay >= min_block_bytes), split further so
    the grid has at least `min_steps` steps (DMA/compute overlap + v7x megacore)."""
    divisors = [d for d in range(n_heads, 0, -1) if n_heads % d == 0]
    legal_divs = [d for d in divisors if legal(d)] or [n_heads]
    hb = next((d for d in legal_divs if d * bytes_per_head <= target_bytes),
              legal_divs[-1])
    if (n_heads // hb) * batch < min_steps:
        for d in legal_divs:
            if (d < hb and (n_heads // d) * batch >= min_steps
                    and d * bytes_per_head >= min_block_bytes):
                hb = d
                break
    return hb


def smear(K, alpha, *, target_block_bytes=2 * 1024 * 1024):
    """Pallas TPU Smear.forward.  K: (B, H, S, D), alpha: (1, H, S-1, 1)."""
    B, H, S, D = K.shape
    assert alpha.shape == (1, H, S - 1, 1)
    dt = K.dtype
    itemsize = jnp.dtype(dt).itemsize
    row_tile = max(8, 32 // itemsize)  # sublane packing tile: 8 f32, 16 bf16, 32 int8

    # sigmoid once in XLA; prepend 1.0 for the row-0 passthrough.
    sig = jax.nn.sigmoid(alpha.astype(jnp.float32))                           # (1,H,S-1,1)
    sig = jnp.concatenate([jnp.ones((1, H, 1, 1), jnp.float32), sig], axis=2)  # (1,H,S,1)

    bytes_per_head = S * D * itemsize
    compact = (D % 128 == 0)

    if compact:
        # Compact sig: (H*S, 1) in K.dtype; K viewed as (B, H*S, D) (contiguous merge).
        sig_arr = sig.reshape(H * S, 1).astype(dt)
        k_arr = K.reshape(B, H * S, D)
        legal = lambda hb: (hb == H) or ((hb * S) % row_tile == 0)
    else:
        # Lane-dense layout: merge (S, D) -> S*D; sig broadcast over D but in K.dtype.
        sig_arr = jnp.broadcast_to(sig, (1, H, S, D)).reshape(H, S * D).astype(dt)
        k_arr = K.reshape(B, H, S * D)
        legal = lambda hb: (hb == H) or (hb % row_tile == 0)

    hb = _pick_heads_per_block(H, bytes_per_head, target_block_bytes, legal, B)
    grid = (H // hb, B)  # B innermost -> sig block index constant, sig stays resident

    if compact:
        k_spec = pl.BlockSpec((None, hb * S, D), lambda h, b: (b, h, 0))
        sig_spec = pl.BlockSpec((hb * S, 1), lambda h, b: (h, 0))
        kernel = functools.partial(_smear_kernel, shift=1, axis=0)
        flat_shape = (B, H * S, D)
    else:
        k_spec = pl.BlockSpec((None, hb, S * D), lambda h, b: (b, h, 0))
        sig_spec = pl.BlockSpec((hb, S * D), lambda h, b: (h, 0))
        kernel = functools.partial(_smear_kernel, shift=D, axis=1)
        flat_shape = (B, H, S * D)

    out = pl.pallas_call(
        kernel,
        out_shape=jax.ShapeDtypeStruct(flat_shape, dt),
        grid_spec=pltpu.PrefetchScalarGridSpec(
            num_scalar_prefetch=0,
            grid=grid,
            in_specs=[sig_spec, k_spec],
            out_specs=k_spec,
        ),
        compiler_params=pltpu.CompilerParams(
            dimension_semantics=("parallel", "parallel"),
        ),
        cost_estimate=pl.CostEstimate(
            flops=4 * B * H * S * D,
            transcendentals=0,
            bytes_accessed=2 * B * H * S * D * itemsize + sig_arr.size * itemsize,
        ),
    )(sig_arr, k_arr)
    return out.reshape(B, H, S, D)


def smear_ref(K, alpha):
    sig = jax.nn.sigmoid(alpha)
    smeared = K[:, :, 1:, :] * sig + K[:, :, :-1, :] * (1.0 - sig)
    return jnp.concatenate([K[:, :, 0:1, :], smeared], axis=2)


if __name__ == "__main__":
    key = jax.random.PRNGKey(0)

    # Exercise both layouts: lane-dense (D=32) and compact (D=128).
    for (B, H, S, D) in [(2, 4, 8, 32), (2, 4, 8, 128)]:
        key, k_key, a_key = jax.random.split(key, 3)
        K = jax.random.normal(k_key, (B, H, S, D), dtype=jnp.float32)
        # Module init is ones; perturb deterministically so the per-(head, position)
        # sigmoid broadcast is actually exercised.
        alpha = jnp.ones((1, H, S - 1, 1), jnp.float32) + 0.5 * jax.random.normal(
            a_key, (1, H, S - 1, 1), dtype=jnp.float32
        )

        out = jax.block_until_ready(smear(K, alpha))
        expected = smear_ref(K, alpha)

        assert out.shape == (B, H, S, D)
        assert jnp.allclose(out, expected, atol=1e-5, rtol=1e-5), (
            f"mismatch vs reference at shape {(B, H, S, D)}"
        )

    print("KERNEL_OK")
</pallas_src>

<mosaic_0001>
module attributes {stable_mosaic.version = 11 : i64} {
  func.func @_smear_kernel(%arg0: i32, %arg1: i32, %arg2: memref<4x256xf32, #tpu.memory_space<vmem>>, %arg3: memref<1x4x256xf32, #tpu.memory_space<vmem>>, %arg4: memref<1x4x256xf32, #tpu.memory_space<vmem>>) attributes {dimension_semantics = [#tpu.dimension_semantics<parallel>, #tpu.dimension_semantics<parallel>], iteration_bounds = array<i64: 1, 2>, scalar_prefetch = 0 : i64, scratch_operands = 0 : i64, tpu.core_type = #tpu.core_type<tc>, window_params = [{transform_indices = @transform_0, window_bounds = array<i64: 4, 256>}, {transform_indices = @transform_1, window_bounds = array<i64: 1, 4, 256>}, {transform_indices = @transform_2, window_bounds = array<i64: 1, 4, 256>}]} {
    %c0 = arith.constant 0 : index
    %c0_0 = arith.constant 0 : index
    %c0_1 = arith.constant 0 : index
    %0 = vector.load %arg3[%c0, %c0_0, %c0_1] : memref<1x4x256xf32, #tpu.memory_space<vmem>>, vector<1x4x256xf32>
    %1 = vector.shape_cast %0 : vector<1x4x256xf32> to vector<4x256xf32>
    %c0_2 = arith.constant 0 : index
    %c0_3 = arith.constant 0 : index
    %2 = vector.load %arg2[%c0_2, %c0_3] : memref<4x256xf32, #tpu.memory_space<vmem>>, vector<4x256xf32>
    %c32_i32 = arith.constant 32 : i32
    %3 = tpu.dynamic_rotate %1 by %c32_i32 dim 1 : vector<4x256xf32>, i32 -> vector<4x256xf32>
    %4 = arith.mulf %2, %1 : vector<4x256xf32>
    %cst = arith.constant 1.000000e+00 : f32
    %5 = vector.broadcast %cst : f32 to vector<4x256xf32>
    %6 = arith.subf %5, %2 : vector<4x256xf32>
    %7 = arith.mulf %6, %3 : vector<4x256xf32>
    %8 = arith.addf %4, %7 : vector<4x256xf32>
    %c0_4 = arith.constant 0 : index
    %c0_5 = arith.constant 0 : index
    %c0_6 = arith.constant 0 : index
    %9 = vector.load %arg4[%c0_4, %c0_5, %c0_6] : memref<1x4x256xf32, #tpu.memory_space<vmem>>, vector<1x4x256xf32>
    %10 = vector.shape_cast %9 : vector<1x4x256xf32> to vector<4x256xf32>
    %11 = vector.shape_cast %8 : vector<4x256xf32> to vector<1x4x256xf32>
    tpu.vector_store %arg4[%c0_4, %c0_5, %c0_6], %11 {strides = array<i32>} : memref<1x4x256xf32, #tpu.memory_space<vmem>>, vector<1x4x256xf32>,
    return
  }
  func.func @transform_0(%arg0: i32, %arg1: i32) -> (i32, i32) {
    %c0_i32 = arith.constant 0 : i32
    %c0_i32_0 = arith.constant 0 : i32
    return %arg0, %c0_i32 : i32, i32
  }
  func.func @transform_1(%arg0: i32, %arg1: i32) -> (i32, i32, i32) {
    %c0_i32 = arith.constant 0 : i32
    %c0_i32_0 = arith.constant 0 : i32
    return %arg1, %arg0, %c0_i32 : i32, i32, i32
  }
  func.func @transform_2(%arg0: i32, %arg1: i32) -> (i32, i32, i32) {
    %c0_i32 = arith.constant 0 : i32
    %c0_i32_0 = arith.constant 0 : i32
    return %arg1, %arg0, %c0_i32 : i32, i32, i32
  }
}

</mosaic_0001>

<bundles_post_ra>
// kernel: tpu_custom_call.1
= control target key start
LH: loop header
LB: loop body
LE: loop exit
PB: predicated region body
PF: predicated region fallthrough
CT: control target
= control target key end

     0   :  { %7 = vsyncpa [#allocation3], 0  ;;  %s812_s0 = inlined_call_operand.hbm [shape: f32[4,256], index: 0, kind: input, shape index: {}]   ;;  %s813_s1 = inlined_call_operand.hbm [shape: f32[2,4,256], index: 1, kind: input, shape index: {}]   ;;  %s814_s2 = inlined_call_operand.hbm [shape: f32[2,4,256], index: 2, kind: output, shape index: {}]  }
   0x1   :  { %8 = vsyncpa [#allocation6], 0 }
   0x2   :  { %10 = vsyncpa [#allocation6 + $0x1], 0 }
   0x3   :  { %11 = vsyncpa [#allocation4], 0 }
   0x4   :  { %13 = vsyncpa [#allocation4 + $0x1], 0  ;;  %s596_s9 = smov 0   ;;  %s598_s10 = smov 0  }
   0x5   :  { %s600_s11 = smov 0   ;;  %s602_s12 = smov 0  }
   0x6   :  { %s604_s13 = smov 0   ;;  %s606_s14 = smov 0  }
   0x7 LB: > { %s337_s15 = sadd.s32 4294967295, %s575_s14   ;;  %s338_s16 = sadd.s32 4294967294, %s575_s14   ;;  %s575_s14 = sphi %s606_s14, %s19_s14   ;;  %s571_s13 = sphi %s604_s13, %s839_s13   ;;  %s567_s12 = sphi %s602_s12, %s838_s12   ;;  %s563_s11 = sphi %s600_s11, %s837_s11   ;;  %s559_s10 = sphi %s598_s10, %s836_s10   ;;  %s555_s9 = sphi %s596_s9, %s835_s9  }
   0x8   : > { %p79_p0 = scmp.ne.s32.totalorder %s559_s10, %s555_s9  ;;  %p630_p1 = scmp.eq.s32.totalorder %s337_s15, 0 }
   0x9   : > { %p634_p2 = scmp.eq.s32.totalorder %s337_s15, 1  ;;  %p111_p3 = scmp.eq.s32.totalorder %s338_s16, 1 }
   0xa   : > { %s819_s17 = scalar_select %p630_p1, 1, 0 }
   0xb   : > { %s820_s18 = scalar_select %p634_p2, 1, 0 }
   0xc   : > { %p640_p4 = por %p630_p1, %p79_p0  ;;  %p339_p5 = scmp.ge.s32.totalorder %s575_s14, 1 }
   0xd   : > { %p645_p6 = por %p111_p3, %p79_p0  ;;  %p118_p7 = scmp.lt.s32.totalorder %s575_s14, 3 }
   0xe   : > { %s821_s19 = scalar_select %p640_p4, 1, 0 }
   0xf   : > { %s822_s20 = scalar_select %p645_p6, 1, 0 }
  0x10   : > { %p650_p8 = pnand %p339_p5, %p118_p7  ;;  %s577_s22 = smov [#allocation2]  }
  0x11   : > { %s134_s23 = sshll.u32 %s577_s22, 4  ;;  %s28_s25 = sadd.s32 1, %s571_s13  ;;  %s135_s23 = int_to_ptr.vmem [resolvable:$true] %s134_s23 }
  0x12   : > { %s823_s21 = scalar_select %p650_p8, 1, 0 }
  0x13   : > { %p364_p10 = pneg %p650_p8  ;;  %s66_s26 = sadd.s32 1, %s563_s11 }
  0x14   : > { %p665_p12 = scmp.ge.s32.totalorder %s28_s25, 2  ;;  %s431_s30 = scalar_lea.hbm %s812_s0, 128 }
  0x15   : > { %p659_p11 = pnand %p364_p10, %p630_p1  ;;  %p432_p13 = scmp.ne.s32.totalorder %s812_s0, %s431_s30 }
  0x16   : > { %s825_s27 = scalar_select %p665_p12, 1, 0 }
  0x17   : > { %p433_p0 = pneg %p659_p11  ;;  %p438_p7 = scmp.lt.u32.totalorder %s431_s30, %s812_s0 }
  0x19   : > { %p434_p3 = pnand %p433_p0, %p432_p13 }
  0x1b   : > { %p435_p5 = pneg %p434_p3 }
  0x1d   : > { %p440_p10 = pnand %p438_p7, %p435_p5 }
  0x1f   : > { %443 = shalt.err (!%p440_p10)
}
  0x20   : > { %s444_s7 = scalar_lea.vmem %s135_s23, 128  ;;  %p452_p1 = scmp.lt.s32.totalorder %s135_s23, %s135_s23 }
  0x21   : > { %p445_p9 = scmp.ne.s32.totalorder %s135_s23, %s444_s7  ;;  %p453_p8 = scmp.lt.s32.totalorder %s444_s7, %s444_s7 }
  0x23   : > { %p447_p6 = pnand %p445_p9, %p433_p0  ;;  %p454_p2 = por %p453_p8, %p452_p1 }
  0x25   : > { %p448_p4 = pneg %p447_p6 }
  0x27   : > { %p455_p12 = pnand %p454_p2, %p448_p4 }
  0x29   : > { %458 = shalt.err (!%p455_p12)
}
  0x2a   : > { %367 = dma.hbm_to_vmem [thread:$0]  (!%p659_p11), %s812_s0, 128, %s135_s23, [#allocation3]  }
  0x2b   : > { %p826_p1 = scmp.ne.s32.totalorder %s825_s27, 0  ;;  %p73_p2 = scmp.ne.s32.totalorder %s563_s11, %s559_s10 }
  0x2c   : > { %p74_p4 = scmp.eq.s32.totalorder %s575_s14, 0  ;;  %p377_p6 = scmp.lt.s32.totalorder %s575_s14, 2 }
  0x2d   : > { %s841_s25 = smov (%p826_p1, %s28_s25), 0  ;;  %p827_p12 = scmp.ne.s32.totalorder %s820_s18, 0 }
  0x2e   : > { %s61_s16 = ssub.s32 %s571_s13, %s841_s25  ;;  %p75_p9 = por %p74_p4, %p73_p2 }
  0x2f   : > { %p64_p8 = scmp.eq.s32.totalorder %s61_s16, 0  ;;  %p697_p13 = por %p827_p12, %p73_p2 }
  0x30   : > { %s145_s24 = sand.u32 1, %s563_s11   ;;  %s354_s27 = sshll.u32 %s571_s13, 7 }
  0x31   : > { %s705_s28 = scalar_select %p64_p8, %s563_s11, %s66_s26  }
  0x32   : > { %s342_s23 = sshll.u32 %s145_s24, 3  ;;  %s711_s3 = scalar_lea.hbm %s813_s1, %s354_s27 }
  0x33   : > { %s149_s18 = scalar_lea.vmem [#allocation5], %s342_s23  ;;  %p715_p11 = pnand %p377_p6, %p75_p9 }
  0x34   : > { %s159_s4 = sshll.u32 %s149_s18, 4  ;;  %s146_s26 = scalar_lea.sflag [#allocation6], %s145_s24  ;;  %s713_s4 = int_to_ptr.vmem [resolvable:$true] %s159_s4 }
  0x35   : > { %s459_s6 = scalar_lea.hbm %s711_s3, 128  ;;  %p461_p3 = pneg %p715_p11 }
  0x36   : > { %p460_p0 = scmp.ne.s32.totalorder %s711_s3, %s459_s6  ;;  %s464_s15 = scalar_lea.hbm %s813_s1, 256 }
  0x37   : > { %p465_p10 = scmp.lt.u32.totalorder %s711_s3, %s813_s1  ;;  %p466_p1 = scmp.lt.u32.totalorder %s464_s15, %s459_s6 }
  0x38   : > { %p462_p5 = pnand %p461_p3, %p460_p0  ;;  %p468_p4 = scmp.lt.u32.totalorder %s459_s6, %s711_s3 }
  0x39   : > { %p467_p2 = por %p466_p1, %p465_p10 }
  0x3a   : > { %p463_p7 = pneg %p462_p5 }
  0x3b   : > { %p469_p6 = por %p468_p4, %p467_p2 }
  0x3d   : > { %p470_p8 = pnand %p469_p6, %p463_p7 }
  0x3f   : > { %473 = shalt.err (!%p470_p8)
}
  0x40   : > { %s474_s24 = scalar_lea.vmem %s713_s4, 128  ;;  %s578_s27 = smov [#allocation5]  }
  0x41   : > { %p475_p9 = scmp.ne.s32.totalorder %s713_s4, %s474_s24  ;;  %s479_s29 = sshll.u32 %s578_s27, 4  ;;  %s480_s29 = int_to_ptr.vmem [resolvable:$false] %s479_s29 }
  0x42   : > { %s481_s30 = scalar_lea.vmem %s480_s29, 256  ;;  %p482_p5 = scmp.lt.s32.totalorder %s713_s4, %s480_s29 }
  0x43   : > { %p477_p12 = pnand %p475_p9, %p461_p3  ;;  %p483_p10 = scmp.lt.s32.totalorder %s481_s30, %s474_s24 }
  0x45   : > { %p478_p0 = pneg %p477_p12  ;;  %p484_p1 = por %p483_p10, %p482_p5 }
  0x47   : > { %p485_p2 = pnand %p484_p1, %p478_p0 }
  0x49   : > { %488 = shalt.err (!%p485_p2)
}
  0x4a   : > { %371 = dma.hbm_to_vmem [thread:$0]  (!%p715_p11), %s711_s3, 128, %s713_s4, %s146_s26  }
  0x4b   : > { %p830_p7 = scmp.ne.s32.totalorder %s823_s21, 0 }
  0x4c   : > { %p831_p3 = scmp.ne.s32.totalorder (!%p830_p7), %s819_s17, 0 }
  0x4d   : > { %168 = sbr.rel (%p830_p7) target bundleno = 230 (0xe6), region = 28 }
  0x54   : > { %542 = dma.done.wait (%p831_p3), [#allocation3], 128  }
  0x55   : > { %544 = vsyncadd (%p831_p3), [#allocation3], 4294967168  ;;  %s751_s18 = sand.u32 1, %s559_s10   ;;  %p832_p4 = scmp.ne.s32.totalorder %s821_s19, 0 }
  0x56   : > { %s347_s6 = sshll.u32 %s751_s18, 3  ;;  %s175_s5 = scalar_lea.sflag [#allocation6], %s751_s18 }
  0x57   : > { %s178_s7 = scalar_lea.vmem [#allocation5], %s347_s6 }
  0x58   : > { %546 = dma.done.wait (%p832_p4), %s175_s5, 128  }
  0x59   : > { %548 = vsyncadd (%p832_p4), %s175_s5, 4294967168  ;;  %v199_v0 = vld [vmem:[%s178_s7] sm:$0xff]  ;;  %s579_s21 = smov 32   ;;  %v208_v2 = vlaneseq  ;;  %v200_v5 = vld [vmem:[#allocation2] sm:$0xff]  ;;  %s355_s17 = sshll.u32 %s567_s12, 7 }
  0x5a   : > { %204 = vrot.lane.b32.xlu0 %v199_v0, %s579_s21  ;;  %v202_v1 = vcombine.high %v199_v0, %v199_v0  ;;  %v214_v6 = vsub.f32 1.0, %v200_v5  ;;  %v213_v10 = vmul.f32 %v200_v5, %v199_v0  ;;  %s198_s19 = scalar_lea.vmem [#allocation7], %s347_s6  ;;  %s763_s8 = scalar_lea.hbm %s814_s2, %s355_s17 }
  0x5b   : > { %v209_v3 = vand.u32 127, %v208_v2  ;;  %s239_s3 = sshll.u32 %s198_s19, 4  ;;  %s223_s15 = scalar_lea.sflag [#allocation4], %s751_s18  ;;  %s765_s3 = int_to_ptr.vmem [resolvable:$true] %s239_s3 }
  0x5c   : > { %s489_s16 = scalar_lea.vmem %s765_s3, 128  ;;  %s580_s12 = smov [#allocation7]  }
  0x5d   : > { %vm210_vm0 = vcmp.lt.s32.totalorder %v209_v3, 32  ;;  %p490_p11 = scmp.ne.s32.totalorder %s765_s3, %s489_s16  ;;  %s493_s23 = sshll.u32 %s580_s12, 4  ;;  %s494_s23 = int_to_ptr.vmem [resolvable:$false] %s493_s23 }
  0x5e   : > { %206 = vrot.lane.b32.xlu0 %v202_v1, %s579_s21  ;;  %s495_s24 = scalar_lea.vmem %s494_s23, 256  ;;  %p496_p9 = scmp.lt.s32.totalorder %s765_s3, %s494_s23 }
  0x5f   : > { %p491_p6 = pnand %p490_p11, %p697_p13  ;;  %p497_p12 = scmp.lt.s32.totalorder %s495_s24, %s489_s16 }
  0x61   : > { %p492_p8 = pneg %p491_p6  ;;  %p498_p0 = por %p497_p12, %p496_p9 }
  0x63   : > { %p499_p5 = pnand %p498_p0, %p492_p8 }
  0xcc   : > { %v205_v4 = vpop.permute.xlu0 %204 }
  0xd0   : > { %v207_v7 = vpop.permute.xlu0 %206 }
  0xd1   : > { %v211_v8 = vsel %vm210_vm0, %v205_v4, %v207_v7  ;;  %v212_v9 = vsel %vm210_vm0, %v207_v7, %v205_v4 }
  0xd2   : > { %v217_v11 = vcombine.low %v212_v9, %v211_v8 }
  0xd4   : > { %v219_v12 = vmul.f32 %v217_v11, %v214_v6 }
  0xd6   : > { %v220_v13 = vadd.f32 %v219_v12, %v213_v10 }
  0xd8   : > { %221 = vst [vmem:[%s198_s19] sm:$0xff] %v220_v13 }
  0xd9   : > { %502 = shalt.err (!%p499_p5)
}
  0xda   : > { %s503_s27 = scalar_lea.hbm %s763_s8, 128  ;;  %s507_s18 = scalar_lea.hbm %s814_s2, 256 }
  0xdb   : > { %p504_p10 = scmp.ne.s32.totalorder %s763_s8, %s503_s27  ;;  %p508_p7 = scmp.lt.u32.totalorder %s763_s8, %s814_s2 }
  0xdc   : > { %p509_p3 = scmp.lt.u32.totalorder %s507_s18, %s503_s27  ;;  %p511_p11 = scmp.lt.u32.totalorder %s503_s27, %s763_s8 }
  0xdd   : > { %p505_p1 = pnand %p504_p10, %p697_p13 }
  0xde   : > { %p510_p4 = por %p509_p3, %p508_p7 }
  0xdf   : > { %p506_p2 = pneg %p505_p1 }
  0xe0   : > { %p512_p6 = por %p511_p11, %p510_p4 }
  0xe2   : > { %p513_p8 = pnand %p512_p6, %p506_p2 }
  0xe4   : > { %516 = shalt.err (!%p513_p8)
}
  0xe5   : > { %362 = dma.vmem_to_hbm [thread:$0]  (%p697_p13), %s765_s3, 128, %s763_s8, %s223_s15  }
  0xe6 PF: > { %s251_s7 = sand.u32 1, %s555_s9   ;;  %p833_p9 = scmp.ne.s32.totalorder %s822_s20, 0 }
  0xe7   : > { %p834_p12 = scmp.ge.s32.totalorder %s575_s14, 2  ;;  %s252_s21 = scalar_lea.sflag [#allocation4], %s251_s7 }
  0xe9   : > { %p373_p0 = pnand %p834_p12, %p833_p9 }
  0xeb   : > { %550 = dma.done.wait (!%p373_p0), %s252_s21, 128  }
  0xec   : > { %552 = vsyncadd (!%p373_p0), %s252_s21, 4294967168  ;;  %s19_s14 = sadd.s32 1, %s575_s14   ;;  %s835_s9 = smov %s559_s10 }
  0xed   : > { %p16_p5 = scmp.ge.s32.totalorder %s19_s14, 4   ;;  %s836_s10 = smov %s563_s11 }
  0xee   : > { %s837_s11 = smov %s705_s28  ;;  %s838_s12 = smov %s571_s13 }
  0xef   : > { %s839_s13 = smov %s841_s25  ;;  %18 = sbr.rel (!%p16_p5) target bundleno = 7 (0x7), region = 79 }
  0xf6   :  { %257 = vsyncpa [#allocation3], 1 }
  0xf7   :  { %259 = vsyncpa [#allocation3 + $0x1], 1 }
  0xf8   :  { %260 = vsyncpa [#allocation6], 1 }
  0xf9   :  { %262 = vsyncpa [#allocation6 + $0x1], 1 }
  0xfa   :  { %263 = vsyncpa [#allocation4], 1 }
  0xfb   :  { %265 = vsyncpa [#allocation4 + $0x1], 1 }

</bundles_post_ra>
